<compile_context>
chip_gen: v7x
topology: tpu7x:2x2x1
jax: 0.10.0
libtpu: 0.0.40
codegen_flags: <defaults>
</compile_context>

<pallas_src>
import functools

import jax
import jax.numpy as jnp
from jax import lax
from jax.experimental import pallas as pl
from jax.experimental.pallas import tpu as pltpu


def _l2_normalize(x, axis, eps=1e-12):
    # matches torch.nn.functional.normalize(x, dim=axis)
    n = jnp.sqrt(jnp.sum(x * x, axis=axis, keepdims=True))
    return x / jnp.maximum(n, eps)


# --------------------------------------------------------------------------- #
# Pallas kernel: sum(exp(scale*(dot-1))) over the queue, tiled over the queue. #
# --------------------------------------------------------------------------- #
def _queue_sumexp_kernel(scale_ref, f_ref, q_ref, acc_ref):
    """Grid: (stream s in {0,1} -> 'parallel', queue tile k -> 'arbitrary').

    Stream 0: vision feats vs text_queue rows; stream 1: text feats vs
    vision_queue rows.  acc (B, 1) f32 accumulates sum_j exp(scale*(dot_j - 1))
    for the current stream; since all vectors are unit-norm, dot <= 1 so the
    exponent never overflows (constant max == scale).
    """
    @pl.when(pl.program_id(1) == 0)
    def _():
        acc_ref[...] = jnp.zeros_like(acc_ref)

    scale = scale_ref[0]                       # = queue_weight / temperature
    dn = (((1,), (1,)), ((), ()))              # contract the feature dim

    # bf16 x bf16 -> f32 on the MXU: (B, D) x (q_tile, D) -> (B, q_tile)
    dots = lax.dot_general(f_ref[...], q_ref[...], dn,
                           preferred_element_type=jnp.float32)
    acc_ref[...] += jnp.sum(jnp.exp((dots - 1.0) * scale), axis=-1, keepdims=True)


def _tile_config(Q, D, itemsize):
    """Generation-aware queue tile + VMEM limit.

    Each grid step streams ONE queue tile (the other stream is carried by the
    parallel grid axis), double-buffered -> footprint ~ 2 * tile * D * itemsize.
    """
    try:
        vmem_cap = int(pltpu.get_tpu_info().vmem_capacity_bytes)
    except Exception:
        vmem_cap = 64 * 1024 * 1024            # conservative fallback (v7x-like)

    if vmem_cap >= 96 * 1024 * 1024:           # v5e / v6e: 128 MiB physical VMEM
        buf_budget = 28 * 1024 * 1024
        vmem_limit = 64 * 1024 * 1024
        target_steps = 2                       # few huge tiles: amortize ~0.35us/step
    else:                                       # v7x: 64 MiB physical VMEM
        buf_budget = 12 * 1024 * 1024
        vmem_limit = 32 * 1024 * 1024
        target_steps = 4

    cap = max(16, buf_budget // (2 * D * itemsize))
    tile = min(Q, max(16, pl.cdiv(Q, target_steps)), cap)
    tile = max(16, (tile // 16) * 16)
    while tile >= 16 and Q % tile != 0:
        tile -= 16
    if tile < 16 or Q % tile != 0:
        tile = Q
    return tile, vmem_limit


def _queue_sumexp(feats_bf16, queues, scale, *, q_tile=None):
    """feats_bf16: (2, B, D) bf16; queues: (2, Q, D) bf16.  Returns (2, B, 1) f32."""
    S, B, D = feats_bf16.shape
    Q = queues.shape[1]
    if q_tile is None:
        q_tile, vmem_limit = _tile_config(Q, D, jnp.dtype(queues.dtype).itemsize)
    else:
        vmem_limit = 64 * 1024 * 1024
    assert Q % q_tile == 0

    scale_arr = jnp.asarray(scale, jnp.float32).reshape((1,))

    return pl.pallas_call(
        _queue_sumexp_kernel,
        out_shape=jax.ShapeDtypeStruct((S, B, 1), jnp.float32),
        grid_spec=pltpu.PrefetchScalarGridSpec(
            num_scalar_prefetch=0,
            grid=(S, Q // q_tile),
            in_specs=[
                pl.BlockSpec(memory_space=pltpu.MemorySpace.SMEM),        # scale (1,) f32
                pl.BlockSpec((None, B, D), lambda s, k: (s, 0, 0)),       # feats (resident)
                pl.BlockSpec((None, q_tile, D), lambda s, k: (s, k, 0)),  # queue tile
            ],
            out_specs=pl.BlockSpec((None, B, 1), lambda s, k: (s, 0, 0)),
        ),
        compiler_params=pltpu.CompilerParams(
            dimension_semantics=("parallel", "arbitrary"),
            vmem_limit_bytes=vmem_limit,
        ),
    )(scale_arr, feats_bf16, queues)


# --------------------------------------------------------------------------- #
# Jitted device step: normalize -> kernel -> tiny BxB epilogue -> queue update #
# Queue buffer (arg 3) is DONATED so the ring-buffer scatter is in-place.      #
# --------------------------------------------------------------------------- #
@functools.partial(jax.jit, donate_argnums=(3,))
def _device_step(vision, text, match_ids, queues, queue_scale, inv_temp, ptr):
    vision = vision.astype(jnp.float32)
    text = text.astype(jnp.float32)
    vn = _l2_normalize(vision, axis=1)
    tn = _l2_normalize(text, axis=1)
    vb = vn.astype(jnp.bfloat16)
    tb = tn.astype(jnp.bfloat16)
    feats = jnp.stack([vb, tb])                      # (2, B, D) bf16

    # Memory-bound queue reduction in Pallas (bf16 streams, f32 accumulation).
    sums = _queue_sumexp(feats, queues, queue_scale)       # (2, B, 1) f32
    log_q = queue_scale + jnp.log(jnp.maximum(sums[:, :, 0], 1e-30))   # (2, B)
    log_q_v, log_q_t = log_q[0], log_q[1]

    # In-batch epilogue (B x B, tiny) in plain JAX.
    match = match_ids[:, None] == match_ids[None, :]
    neg = jnp.logical_not(match)
    sim = (vn @ tn.T) * inv_temp                     # f32 (B, B)
    simT = sim.T                                     # reuse, no second matmul

    def neg_lse(neg_logits, lq):                     # stable logsumexp over all negatives
        m = jnp.maximum(jnp.max(neg_logits, axis=1), lq)
        s = jnp.sum(jnp.exp(neg_logits - m[:, None]), axis=1) + jnp.exp(lq - m)
        return m + jnp.log(s)

    neg_lse_v = neg_lse(jnp.where(neg, sim, -jnp.inf), log_q_v)    # (B,)
    neg_lse_t = neg_lse(jnp.where(neg, simT, -jnp.inf), log_q_t)   # (B,)

    def pair_loss(pos, nlse):                        # log(exp(pos) + neg_sum) - pos, stable
        m = jnp.maximum(pos, nlse[:, None])
        return m + jnp.log(jnp.exp(pos - m) + jnp.exp(nlse[:, None] - m)) - pos

    v2t = jnp.sum(jnp.where(match, pair_loss(sim, neg_lse_v), 0.0))
    t2v = jnp.sum(jnp.where(match, pair_loss(simT, neg_lse_t), 0.0))

    npp = jnp.sum(match.astype(jnp.float32))
    denom = jnp.maximum(npp, 1.0)
    v2t_n = v2t / denom
    t2v_n = t2v / denom
    loss = jnp.where(npp > 0, (v2t_n + t2v_n) * 0.5, jnp.float32(0.0))

    # In-place ring-buffer update (queues donated -> aliased scatter, no copy).
    B = vision.shape[0]
    Q = queues.shape[1]
    idx = (ptr + jnp.arange(B, dtype=jnp.int32)) % Q
    new_queues = queues.at[0, idx, :].set(tb)        # text_queue rows   <- text feats
    new_queues = new_queues.at[1, idx, :].set(vb)    # vision_queue rows <- vision feats

    return loss, v2t_n, t2v_n, new_queues


# --------------------------------------------------------------------------- #
# Module wrapper mirroring MemoryQueueContrastiveLoss.forward                  #
# --------------------------------------------------------------------------- #
class MemoryQueueContrastiveLossPallas:
    def __init__(self, dim=512, queue_size=8192, temperature=0.07, key=None):
        self.temperature = temperature
        self.queue_size = queue_size
        self.dim = dim
        self.initial_temperature = temperature
        self.max_temperature = temperature * 1.3
        self.initialized = False
        self.queue_ptr = 0
        self.queue_fill_level = 0
        # Single stacked buffer: queues[0] = text_queue, queues[1] = vision_queue,
        # each [Q, D] bf16 (row k here == column k of the PyTorch (dim, Q) buffer).
        self.queues = None
        self._key = key if key is not None else jax.random.PRNGKey(0)

    def _maybe_init_queues(self, feature_dim):
        if self.initialized and self.queues.shape[-1] == feature_dim:
            return
        k1, k2, self._key = jax.random.split(self._key, 3)
        vq = jax.random.normal(k1, (self.queue_size, feature_dim), jnp.float32)
        tq = jax.random.normal(k2, (self.queue_size, feature_dim), jnp.float32)
        self.queues = jnp.stack([
            _l2_normalize(tq, axis=1),          # [0] text_queue
            _l2_normalize(vq, axis=1),          # [1] vision_queue
        ]).astype(jnp.bfloat16)
        self.queue_ptr = 0
        self.queue_fill_level = 0
        self.initialized = True

    def __call__(self, vision_features, text_features, match_ids):
        feature_dim = vision_features.shape[1]
        batch_size = vision_features.shape[0]
        self._maybe_init_queues(feature_dim)

        # Host-side scalar schedule (depends only on host-tracked fill level).
        fill_level = min(int(self.queue_fill_level), self.queue_size)
        fill_ratio = fill_level / self.queue_size
        effective_temperature = (self.max_temperature
                                 - (self.max_temperature - self.initial_temperature) * fill_ratio)
        if fill_ratio >= 0.95:
            effective_temperature = self.initial_temperature
        queue_weight = min(1.0, fill_ratio * 1.5)
        if fill_ratio < 0.2:
            queue_weight = fill_ratio * 0.5

        loss, v2t, t2v, new_queues = _device_step(
            vision_features, text_features, jnp.asarray(match_ids),
            self.queues,
            jnp.float32(queue_weight / effective_temperature),
            jnp.float32(1.0 / effective_temperature),
            jnp.int32(self.queue_ptr))

        # Host-side ring-buffer bookkeeping (no compute, no device sync).
        self.queues = new_queues
        self.queue_ptr = (self.queue_ptr + batch_size) % self.queue_size
        self.queue_fill_level = min(self.queue_fill_level + batch_size, self.queue_size)

        # TODO(synk): PyTorch's random 1% logging print and .item() host syncs are
        # intentionally omitted; loss_v2t/loss_t2v stay on device to keep the step async.
        return {"loss": loss,
                "loss_v2t": v2t,
                "loss_t2v": t2v,
                "temperature": effective_temperature,
                "queue_fill": fill_ratio}


# --------------------------------------------------------------------------- #
# Pure-JAX reference (vectorized version of the PyTorch double loop)           #
# --------------------------------------------------------------------------- #
def _reference_loss(vn, tn, text_queue_qd, vision_queue_qd, match, inv_temp, queue_weight):
    sim = (vn @ tn.T) * inv_temp
    tq = text_queue_qd.astype(jnp.float32)
    vq = vision_queue_qd.astype(jnp.float32)
    # Mirror the kernel's bf16 feature stream for the queue similarities.
    vb = vn.astype(jnp.bfloat16).astype(jnp.float32)
    tb = tn.astype(jnp.bfloat16).astype(jnp.float32)
    v2q = (vb @ tq.T) * inv_temp * queue_weight
    t2q = (tb @ vq.T) * inv_temp * queue_weight
    neg = 1.0 - match
    neg_v = jnp.sum(jnp.exp(sim) * neg, axis=1) + jnp.sum(jnp.exp(v2q), axis=1)
    neg_t = jnp.sum(jnp.exp(sim.T) * neg, axis=1) + jnp.sum(jnp.exp(t2q), axis=1)
    v2t = jnp.sum(match * (jnp.log(jnp.exp(sim) + neg_v[:, None]) - sim))
    t2v = jnp.sum(match * (jnp.log(jnp.exp(sim.T) + neg_t[:, None]) - sim.T))
    npp = jnp.sum(match)
    return ((v2t / npp) + (t2v / npp)) / 2.0


if __name__ == "__main__":
    B, D, Q = 8, 32, 512  # small shapes: batch=8, feature dim=32, queue=512

    key = jax.random.PRNGKey(0)
    k1, k2, k3 = jax.random.split(key, 3)
    vision = jax.random.normal(k1, (B, D), jnp.float32)
    text = jax.random.normal(k2, (B, D), jnp.float32)
    match_ids = jnp.array([0, 0, 1, 2, 2, 3, 4, 4], dtype=jnp.int32)

    module = MemoryQueueContrastiveLossPallas(dim=D, queue_size=Q, temperature=0.07, key=k3)

    vn = _l2_normalize(vision, axis=1)
    tn = _l2_normalize(text, axis=1)
    match = (match_ids[:, None] == match_ids[None, :]).astype(jnp.float32)

    # ---- call 1: empty queue (fill_ratio = 0 -> queue_weight = 0) ----
    module._maybe_init_queues(D)
    # Snapshot copies BEFORE the call: the forward donates (and thus invalidates)
    # the stacked queue buffer.
    tq0 = module.queues[0]
    vq0 = module.queues[1]
    jax.block_until_ready((tq0, vq0))
    out1 = module(vision, text, match_ids)
    jax.block_until_ready(out1["loss"])
    ref1 = _reference_loss(vn, tn, tq0, vq0, match, 1.0 / out1["temperature"], 0.0)
    assert jnp.allclose(out1["loss"], ref1, rtol=1e-3, atol=1e-4), (out1["loss"], ref1)

    # ---- call 2: pretend the queue is full (queue_weight = 1, temp = initial) ----
    module.queue_fill_level = module.queue_size
    tq1 = module.queues[0]
    vq1 = module.queues[1]
    jax.block_until_ready((tq1, vq1))
    out2 = module(vision, text, match_ids)
    jax.block_until_ready(out2["loss"])
    ref2 = _reference_loss(vn, tn, tq1, vq1, match, 1.0 / out2["temperature"], 1.0)
    assert jnp.allclose(out2["loss"], ref2, rtol=1e-3, atol=1e-4), (out2["loss"], ref2)

    print("KERNEL_OK")
</pallas_src>

<mosaic_0001>
module attributes {stable_mosaic.version = 11 : i64} {
  func.func @_queue_sumexp_kernel(%arg0: i32, %arg1: i32, %arg2: memref<1xf32, #tpu.memory_space<smem>>, %arg3: memref<1x8x32xbf16, #tpu.memory_space<vmem>>, %arg4: memref<1x128x32xbf16, #tpu.memory_space<vmem>>, %arg5: memref<1x8x1xf32, #tpu.memory_space<vmem>>) attributes {dimension_semantics = [#tpu.dimension_semantics<parallel>, #tpu.dimension_semantics<arbitrary>], iteration_bounds = array<i64: 2, 4>, scalar_prefetch = 0 : i64, scratch_operands = 0 : i64, tpu.core_type = #tpu.core_type<tc>, window_params = [{transform_indices = @transform_0, window_bounds = array<i64: 1>}, {transform_indices = @transform_1, window_bounds = array<i64: 1, 8, 32>}, {transform_indices = @transform_2, window_bounds = array<i64: 1, 128, 32>}, {transform_indices = @transform_3, window_bounds = array<i64: 1, 8, 1>}]} {
    %c0_i32 = arith.constant 0 : i32
    %0 = arith.cmpi eq, %arg1, %c0_i32 : i32
    %1 = arith.extui %0 : i1 to i32
    %c0_i32_0 = arith.constant 0 : i32
    %2 = arith.cmpi ne, %1, %c0_i32_0 : i32
    scf.if %2 {
      %cst_15 = arith.constant 0.000000e+00 : f32
      %22 = vector.broadcast %cst_15 : f32 to vector<8x1xf32>
      %c0_16 = arith.constant 0 : index
      %c0_17 = arith.constant 0 : index
      %c0_18 = arith.constant 0 : index
      %23 = vector.load %arg5[%c0_16, %c0_17, %c0_18] : memref<1x8x1xf32, #tpu.memory_space<vmem>>, vector<1x8x1xf32>
      %24 = vector.shape_cast %23 : vector<1x8x1xf32> to vector<8x1xf32>
      %25 = vector.shape_cast %22 : vector<8x1xf32> to vector<1x8x1xf32>
      tpu.vector_store %arg5[%c0_16, %c0_17, %c0_18], %25 {strides = array<i32>} : memref<1x8x1xf32, #tpu.memory_space<vmem>>, vector<1x8x1xf32>,
    } else {
    }
    %c0 = arith.constant 0 : index
    %3 = memref.load %arg2[%c0] : memref<1xf32, #tpu.memory_space<smem>>
    %c0_1 = arith.constant 0 : index
    %c0_2 = arith.constant 0 : index
    %c0_3 = arith.constant 0 : index
    %4 = vector.load %arg3[%c0_1, %c0_2, %c0_3] : memref<1x8x32xbf16, #tpu.memory_space<vmem>>, vector<1x8x32xbf16>
    %5 = vector.shape_cast %4 : vector<1x8x32xbf16> to vector<8x32xbf16>
    %c0_4 = arith.constant 0 : index
    %c0_5 = arith.constant 0 : index
    %c0_6 = arith.constant 0 : index
    %6 = vector.load %arg4[%c0_4, %c0_5, %c0_6] : memref<1x128x32xbf16, #tpu.memory_space<vmem>>, vector<1x128x32xbf16>
    %7 = vector.shape_cast %6 : vector<1x128x32xbf16> to vector<128x32xbf16>
    %cst = arith.constant dense<0.000000e+00> : vector<8x128xf32>
    %8 = tpu.matmul %5, %7, %cst {dimension_numbers = #tpu.dot_dimension_numbers<[1], [1], [0], [0], [0, 0, 1, 0], [], []>} : vector<8x32xbf16>, vector<128x32xbf16>, vector<8x128xf32> -> vector<8x128xf32>
    %c0_7 = arith.constant 0 : index
    %c0_8 = arith.constant 0 : index
    %c0_9 = arith.constant 0 : index
    %9 = vector.load %arg5[%c0_7, %c0_8, %c0_9] : memref<1x8x1xf32, #tpu.memory_space<vmem>>, vector<1x8x1xf32>
    %10 = vector.shape_cast %9 : vector<1x8x1xf32> to vector<8x1xf32>
    %cst_10 = arith.constant 1.000000e+00 : f32
    %11 = vector.broadcast %cst_10 : f32 to vector<8x128xf32>
    %12 = arith.subf %8, %11 : vector<8x128xf32>
    %13 = vector.broadcast %3 : f32 to vector<8x128xf32>
    %14 = arith.mulf %12, %13 : vector<8x128xf32>
    %15 = math.exp %14 : vector<8x128xf32>
    %cst_11 = arith.constant dense<0.000000e+00> : vector<8xf32>
    %16 = vector.multi_reduction <add>, %15, %cst_11 [1] : vector<8x128xf32> to vector<8xf32>
    %17 = vector.shape_cast %16 : vector<8xf32> to vector<8x1xf32>
    %18 = arith.addf %10, %17 : vector<8x1xf32>
    %c0_12 = arith.constant 0 : index
    %c0_13 = arith.constant 0 : index
    %c0_14 = arith.constant 0 : index
    %19 = vector.load %arg5[%c0_12, %c0_13, %c0_14] : memref<1x8x1xf32, #tpu.memory_space<vmem>>, vector<1x8x1xf32>
    %20 = vector.shape_cast %19 : vector<1x8x1xf32> to vector<8x1xf32>
    %21 = vector.shape_cast %18 : vector<8x1xf32> to vector<1x8x1xf32>
    tpu.vector_store %arg5[%c0_12, %c0_13, %c0_14], %21 {strides = array<i32>} : memref<1x8x1xf32, #tpu.memory_space<vmem>>, vector<1x8x1xf32>,
    return
  }
  func.func @transform_0(%arg0: i32, %arg1: i32) -> i32 {
    %c0_i32 = arith.constant 0 : i32
    %c0_i32_0 = arith.constant 0 : i32
    return %c0_i32 : i32
  }
  func.func @transform_1(%arg0: i32, %arg1: i32) -> (i32, i32, i32) {
    %c0_i32 = arith.constant 0 : i32
    %c0_i32_0 = arith.constant 0 : i32
    %c0_i32_1 = arith.constant 0 : i32
    return %arg0, %c0_i32, %c0_i32_0 : i32, i32, i32
  }
  func.func @transform_2(%arg0: i32, %arg1: i32) -> (i32, i32, i32) {
    %c0_i32 = arith.constant 0 : i32
    %c0_i32_0 = arith.constant 0 : i32
    return %arg0, %arg1, %c0_i32 : i32, i32, i32
  }
  func.func @transform_3(%arg0: i32, %arg1: i32) -> (i32, i32, i32) {
    %c0_i32 = arith.constant 0 : i32
    %c0_i32_0 = arith.constant 0 : i32
    %c0_i32_1 = arith.constant 0 : i32
    return %arg0, %c0_i32, %c0_i32_0 : i32, i32, i32
  }
}

</mosaic_0001>

<bundles_post_ra>
// kernel: _device_step.1
= control target key start
LH: loop header
LB: loop body
LE: loop exit
PB: predicated region body
PF: predicated region fallthrough
CT: control target
= control target key end

     0   :  { %s612_s14 = smov 0   ;;  %s614_s15 = smov 0   ;;  %s697_s0 = inlined_call_operand.<no memory space> [shape: f32[1], index: 0, kind: input, shape index: {}]   ;;  %s698_s1 = inlined_call_operand.vmem [shape: bf16[2,8,32], index: 1, kind: input, shape index: {}]   ;;  %s699_s2 = inlined_call_operand.vmem [shape: bf16[2,512,32], index: 2, kind: input, shape index: {}]   ;;  %s700_s3 = inlined_call_operand.vmem [shape: f32[2,8,1], index: 3, kind: output, shape index: {}]  }
   0x1   :  { %8 = sst [smem:[#allocation2]] %s697_s0  ;;  %s616_s16 = smov 0  }
   0x2   :  { %s618_s17 = smov 0   ;;  %s620_s18 = smov 0  }
   0x3 LB: > { %s23_s0 = sadd.s32 1, %s576_s16  ;;  %s26_s19 = sadd.s32 1, %s580_s17  ;;  %s584_s18 = sphi %s620_s18, %s14_s18   ;;  %s580_s17 = sphi %s618_s17, %s704_s17   ;;  %s576_s16 = sphi %s616_s16, %s703_s16   ;;  %s572_s15 = sphi %s614_s15, %s702_s15   ;;  %s568_s14 = sphi %s612_s14, %s701_s14  }
   0x4   : > { %p24_p0 = scmp.ge.s32.totalorder %s23_s0, 4  ;;  %p445_p1 = scmp.ge.s32.totalorder %s584_s18, 1 }
   0x5   : > { %p166_p2 = scmp.lt.s32.totalorder %s584_s18, 9 }
   0x6   : > { %s706_s0 = smov (%p24_p0, %s23_s0), 0  ;;  %s708_s19 = smov (!%p24_p0, %s26_s19), %s580_s17 }
   0x7   : > { %p167_p3 = pnand %p445_p1, %p166_p2  ;;  %p28_p4 = scmp.ge.s32.totalorder %s708_s19, 2 }
   0x8   : > { %p197_p5 = scmp.lt.s32.totalorder (!%p167_p3), %s572_s15, 1  ;;  %s447_s20 = sshll.u32 (!%p167_p3), %s568_s14, 4 }
   0x9   : > { %s710_s19 = smov (%p28_p4, %s708_s19), 0  ;;  %170 = sbr.rel (%p167_p3) target bundleno = 467 (0x1d3), region = 32 }
   0xa   : > { %p204_p6 = scmp.lt.s32.totalorder (!%p167_p3), %s447_s20, 63  ;;  %p451_p7 = scmp.ne.s32.totalorder (!%p167_p3), %s568_s14, 0 }
  0x10   : > { %s712_s15 = smov (!%p197_p5, %s572_s15), 1  ;;  %s714_s20 = smov (!%p204_p6, %s447_s20), 63 }
  0x11   : > { %s446_s21 = sshll.u32 %s712_s15, 2  ;;  %s448_s22 = sshll.u32 %s712_s15, 6  ;;  %vm220_vm0 = vcmask (!%p451_p7), 7168   ;;  %v586_v0 = vmov (!%p451_p7), 0.0  }
  0x12   : > { %s648_s25 = scalar_lea.vmem %s698_s1, %s446_s21  ;;  %s207_s26 = sadd.s32 %s448_s22, %s714_s20 }
  0x13   : > { %s449_s27 = sshll.u32 %s207_s26, 2  ;;  %s450_s28 = sshll.u32 %s712_s15, 3 }
  0x14   : > { %s653_s4 = scalar_lea.vmem %s699_s2, %s449_s27  ;;  %s658_s7 = scalar_lea.vmem %s700_s3, %s450_s28 }
  0x15   : > { %219 = sbr.rel (%p451_p7) target bundleno = 28 (0x1c), region = 36  ;;  %221 = vst.msk [vmem:[%s658_s7] sm:$0xff] (!%p451_p7), %vm220_vm0, %v586_v0 }
  0x1c PF: > { %v536_v1 = vld [vmem:[%s653_s4] sm:$0xff]   ;;  %v587_v2 = vmov 0.0   ;;  %vm280_vm1 = vcmask 261120   ;;  %v537_v4 = vld [vmem:[%s653_s4 + $0x8] sm:$0xff]   ;;  %vm588_vm2 = vmmov 0   ;;  %v538_v6 = vld [vmem:[%s653_s4 + $0x10] sm:$0xff]  }
  0x1d   : > { %473 = vmatprep.subr.bf16.mxu0 %v587_v2  ;;  %v285_v3 = vsel %vm280_vm1, %v536_v1, 0  ;;  %v288_v5 = vsel %vm280_vm1, %v537_v4, 0  ;;  %489 = vmatprep.mubr.msk.bf16.mxu0 %vm588_vm2, %v587_v2  ;;  %v291_v7 = vsel %vm280_vm1, %v538_v6, 0  ;;  %v539_v8 = vld [vmem:[%s653_s4 + $0x18] sm:$0xff]   ;;  %v540_v10 = vld [vmem:[%s653_s4 + $0x20] sm:$0xff]   ;;  %v541_v12 = vld [vmem:[%s653_s4 + $0x28] sm:$0xff]  }
  0x1e   : > { %474 = vmatpush3.bf16.xpose.msra.mxu0 %v285_v3  ;;  %v294_v9 = vsel %vm280_vm1, %v539_v8, 0  ;;  %v297_v11 = vsel %vm280_vm1, %v540_v10, 0  ;;  %v300_v13 = vsel %vm280_vm1, %v541_v12, 0  ;;  %v542_v14 = vld [vmem:[%s653_s4 + $0x30] sm:$0xff]   ;;  %v543_v16 = vld [vmem:[%s653_s4 + $0x38] sm:$0xff]   ;;  %s222_s8 = sld [smem:[#allocation2]] }
  0x1f   : > { %475 = vmatprep.subr.bf16.mxu0 %v587_v2  ;;  %v303_v15 = vsel %vm280_vm1, %v542_v14, 0  ;;  %v306_v17 = vsel %vm280_vm1, %v543_v16, 0  ;;  %v223_v18 = vld [vmem:[%s648_s25] sm:$0xf]  ;;  %vm357_vm3 = vcmask 7168  }
  0x20   : > { %v348_v28 = vld [vmem:[%s658_s7] sm:$0xff] }
  0x24   : > { %v350_v20 = vstv %s222_s8 }
  0x26   : > { %476 = vmatpush3.bf16.xpose.msra.mxu0 %v288_v5 }
  0x27   : > { %477 = vmatprep.subr.bf16.mxu0 %v587_v2 }
  0x2e   : > { %478 = vmatpush3.bf16.xpose.msra.mxu0 %v291_v7 }
  0x2f   : > { %479 = vmatprep.subr.bf16.mxu0 %v587_v2 }
  0x36   : > { %480 = vmatpush3.bf16.xpose.msra.mxu0 %v294_v9 }
  0x37   : > { %481 = vmatprep.subr.bf16.mxu0 %v587_v2 }
  0x3e   : > { %482 = vmatpush3.bf16.xpose.msra.mxu0 %v297_v11 }
  0x3f   : > { %483 = vmatprep.subr.bf16.mxu0 %v587_v2 }
  0x46   : > { %484 = vmatpush3.bf16.xpose.msra.mxu0 %v300_v13 }
  0x47   : > { %485 = vmatprep.subr.bf16.mxu0 %v587_v2 }
  0x4e   : > { %486 = vmatpush3.bf16.xpose.msra.mxu0 %v303_v15 }
  0x4f   : > { %487 = vmatprep.subr.bf16.mxu0 %v587_v2 }
  0x56   : > { %488 = vmatpush3.bf16.xpose.msra.mxu0 %v306_v17 }
  0x5d   : > { %490 = vmatmul.mubr.msk.bf16.vlgmr.msra.gmra.mrb[0].mxu0 %vm280_vm1, %v223_v18 }
 0x130   : > { %v342_v19 = vpop.f32.mrb[0].mxu0 }
 0x131   : > { %v461_v21 = vadd.f32 -1.0, %v342_v19  ;;  %v491_v22 = vpop.f32.mrb[1].mxu0 }
 0x132   : > { %v345_v23 = vpop.f32.mrb[2].mxu0 }
 0x133   : > { %v351_v24 = vmul.f32 %v461_v21, %v350_v20  ;;  %v492_v25 = vpop.f32.mrb[3].mxu0 }
 0x135   : > { %v352_v26 = vmul.f32 1.442695, %v351_v24 }
 0x137   : > { %544 = vpow2.f32 %v352_v26 }
 0x141   : > { %v545_v27 = vpop.eup %544 }
 0x142   : > { %354 = vadd.xlane.f32.xlu0 %v545_v27 }
 0x1cf   : > { %v355_v29 = vpop.xlane.xlu0 %354 }
 0x1d0   : > { %v356_v30 = vadd.f32 %v355_v29, %v348_v28 }
 0x1d2   : > { %358 = vst.msk [vmem:[%s658_s7] sm:$0xff] %vm357_vm3, %v356_v30 }
 0x1d3 PF: > { %s14_s18 = sadd.s32 1, %s584_s18   ;;  %s701_s14 = smov %s576_s16 }
 0x1d4   : > { %p11_p8 = scmp.ge.s32.totalorder %s14_s18, 10   ;;  %s702_s15 = smov %s580_s17 }
 0x1d5   : > { %s703_s16 = smov %s706_s0  ;;  %s704_s17 = smov %s710_s19 }
 0x1d6   :  { %13 = sbr.rel (!%p11_p8) target bundleno = 3 (0x3), region = 69 }

</bundles_post_ra>
